<compile_context>
chip_gen: v7x
topology: tpu7x:2x2x1
jax: 0.10.0
libtpu: 0.0.40
codegen_flags: <defaults>
</compile_context>

<pallas_src>
from functools import partial

import jax
import jax.numpy as jnp
from jax.experimental import pallas as pl
from jax.experimental.pallas import tpu as pltpu


LANE = 128  # TPU lane width


# ----------------------------------------------------------------------------
# Fused Pallas kernel: conv1 -> relu1 -> conv2 in lane-dense row layout
# ----------------------------------------------------------------------------
def _fused_cnn_kernel(x_ref, m1_ref, bt1_ref, m2_ref, bt2_ref, out_ref, *, H):
    """
    x_ref   : (B*H, W*Cpad)  f32  input rows (channels fastest, 128 lanes)
    m?_ref  : (3*W*Cpad, W*Cmid) bf16  banded conv weights, kh blocks stacked
              along K in [up, mid, down] order
    bt?_ref : (1, W*Cmid)    f32  bias tiled across W
    out_ref : (3, B*H, W*Cmid) f32  recorded maps: [conv1, relu1, conv2]
    """
    R = x_ref.shape[0]          # B*H rows
    B = R // H

    # Edge-row masks for the +/-1 sublane rolls, computed ONCE (hoisted out of
    # both convs) at (R, 1): zero the rows whose roll wraps across the
    # top/bottom image edge (also prevents cross-batch leakage).
    h_idx = jax.lax.broadcasted_iota(jnp.int32, (B, H, 1), 1).reshape(R, 1)
    m_top = (h_idx != 0).astype(jnp.float32)        # zero where h == 0
    m_bot = (h_idx != H - 1).astype(jnp.float32)    # zero where h == H - 1

    def conv3x3_rows(a, m_ref, bt_ref):
        # kh = 0 / 2 taps: shift image rows by +/-1 (sublane roll, XLU) and
        # mask the rows that fall off the H edge (H zero padding).
        up = pltpu.roll(a, shift=1, axis=0) * m_top
        dn = pltpu.roll(a, shift=a.shape[0] - 1, axis=0) * m_bot
        # Single MXU push per conv: lane-concat [up | a | dn] (each piece is a
        # full 128-lane tile, so the concat is vreg-aligned) against the
        # stacked banded weights.  kw taps and the W-direction zero padding
        # are folded into the weights; bf16 operands, f32 accumulation.
        lhs = jnp.concatenate([up, a, dn], axis=-1).astype(m_ref.dtype)
        acc = jnp.dot(lhs, m_ref[...], preferred_element_type=jnp.float32)
        return acc + bt_ref[...]                     # bias added once, f32

    c1 = conv3x3_rows(x_ref[...], m1_ref, bt1_ref)
    out_ref[0] = c1.astype(out_ref.dtype)
    r1 = jnp.maximum(c1, 0.0)                        # ReLU rides in epilogue
    out_ref[1] = r1.astype(out_ref.dtype)
    c2 = conv3x3_rows(r1, m2_ref, bt2_ref)
    out_ref[2] = c2.astype(out_ref.dtype)


# ----------------------------------------------------------------------------
# Host-side parameter folding + pallas_call wrapper
# ----------------------------------------------------------------------------
def _banded_conv_weights(w_oihw, W, cin_pad, dtype=jnp.bfloat16):
    """Fold the kw taps + W-direction zero padding of a 3x3 "same" conv into a
    single (3*W*cin_pad, W*Cout) matrix.  kh blocks are stacked along rows in
    [up, mid, down] order (matching the kernel's lane concat); input channels
    are zero-padded to cin_pad:
        M[kh*W*cin_pad + jp*cin_pad + ci, j*Cout + co] = w[co, ci, kh, kw]
            iff jp == j + kw - 1 and ci < Cin   (else 0).
    """
    cout, cin = int(w_oihw.shape[0]), int(w_oihw.shape[1])
    w_hwio = jnp.transpose(w_oihw, (2, 3, 1, 0)).astype(jnp.float32)  # (3,3,Ci,Co)
    w_hwio = jnp.pad(w_hwio, ((0, 0), (0, 0), (0, cin_pad - cin), (0, 0)))
    blocks = []
    for kh in range(3):
        m = jnp.zeros((W * cin_pad, W * cout), jnp.float32)
        for kw in range(3):
            m = m + jnp.kron(jnp.eye(W, k=1 - kw, dtype=jnp.float32),
                             w_hwio[kh, kw])
        blocks.append(m)
    return jnp.concatenate(blocks, axis=0).astype(dtype)  # (3*W*cin_pad, W*Co)


@partial(jax.jit, static_argnames=("H", "W", "cmid", "cin_pad"))
def _fused_forward(x_nchw, m1, bt1, m2, bt2, *, H, W, cmid, cin_pad):
    B, Cin = x_nchw.shape[0], x_nchw.shape[1]
    R, N = B * H, W * cmid

    # Single entry relayout: NCHW -> NHWC -> zero-pad C to cin_pad -> rows.
    # W * cin_pad == 128, so every kernel load/store is a full unmasked
    # (8,128) tile.  These pre-ops fuse into one XLA fusion under jit.
    x_nhwc = jnp.transpose(x_nchw, (0, 2, 3, 1)).astype(jnp.float32)
    x_nhwc = jnp.pad(x_nhwc, ((0, 0), (0, 0), (0, 0), (0, cin_pad - Cin)))
    x_rows = x_nhwc.reshape(R, W * cin_pad)

    vmem = pl.BlockSpec(memory_space=pltpu.MemorySpace.VMEM)
    out = pl.pallas_call(
        partial(_fused_cnn_kernel, H=H),
        out_shape=jax.ShapeDtypeStruct((3, R, N), jnp.float32),
        in_specs=[vmem, vmem, vmem, vmem, vmem],
        out_specs=vmem,
    )(x_rows, m1, bt1, m2, bt2)
    # TODO(synk): if B ever grows, add a grid over batch-row blocks (>=8 rows)
    # marked "parallel" so v7x's second TensorCore gets used.

    # One combined rows -> NCHW transpose dispatch for all three recorded maps
    # (instead of three separate transposes).
    y = jnp.transpose(out.reshape(3, B, H, W, cmid), (0, 1, 4, 2, 3))
    y = y.astype(x_nchw.dtype)
    return y[0], y[1], y[2]


# ----------------------------------------------------------------------------
# FeatureExtractor (same selection / control flow as the PyTorch module)
# ----------------------------------------------------------------------------
class FeatureExtractor:
    LAYER_NAMES = ("conv1", "relu1", "conv2", "fc")

    def __init__(self, params, extracted_layers, H, W):
        self.params = params
        self.extracted_layers = extracted_layers
        self.H, self.W = H, W
        self.cin = int(params["w1"].shape[1])
        self.cmid = int(params["w1"].shape[0])
        # Pad the input-channel dim so input rows fill a full 128-lane tile.
        self.cin_pad = max(self.cin, LANE // W) if LANE % W == 0 else self.cin
        # One-time parameter folding for the fused Pallas path; banded weights
        # stored in bf16 (halves the dominant weight DMA), biases stay f32.
        self._m1 = _banded_conv_weights(params["w1"], W, self.cin_pad)
        self._bt1 = jnp.tile(params["b1"].astype(jnp.float32), W).reshape(1, -1)
        self._m2 = _banded_conv_weights(params["w2"], W, self.cmid)
        self._bt2 = jnp.tile(params["b2"].astype(jnp.float32), W).reshape(1, -1)

    def _is_selected(self, name):
        return self.extracted_layers is None or (
            name in self.extracted_layers and "fc" not in name)

    def forward(self, x):
        selected = [n for n in self.LAYER_NAMES if self._is_selected(n)]
        outputs = {}
        if selected == ["conv1", "relu1", "conv2"]:
            # Hot path: one fused Pallas kernel emits all three feature maps.
            c1, r1, c2 = _fused_forward(
                x, self._m1, self._bt1, self._m2, self._bt2,
                H=self.H, W=self.W, cmid=self.cmid, cin_pad=self.cin_pad)
            fused = {"conv1": c1, "relu1": r1, "conv2": c2}
            for name in selected:
                x = fused[name]
                print(name)
                outputs[name] = x
        else:
            # TODO(synk): non-standard layer selections fall back to plain JAX
            # per-layer ops (not Pallas); only conv1->relu1->conv2 is fused.
            fns = self._plain_layer_fns()
            for name in self.LAYER_NAMES:
                if self._is_selected(name):
                    x = fns[name](x)
                    print(name)
                    outputs[name] = x
        return outputs

    def _plain_layer_fns(self):
        p = self.params

        def conv(t, w, b):
            y = jax.lax.conv_general_dilated(
                t, w, (1, 1), "SAME",
                dimension_numbers=("NCHW", "OIHW", "NCHW"))
            return y + b[None, :, None, None]

        return {
            "conv1": lambda t: conv(t, p["w1"], p["b1"]),
            "relu1": lambda t: jnp.maximum(t, 0.0),
            "conv2": lambda t: conv(t, p["w2"], p["b2"]),
            "fc": lambda t: t.reshape(t.shape[0], -1) @ p["wf"].T,
        }


# ----------------------------------------------------------------------------
# Main
# ----------------------------------------------------------------------------
if __name__ == "__main__":
    key = jax.random.PRNGKey(0)
    k_x, k_w1, k_b1, k_w2, k_b2, k_wf = jax.random.split(key, 6)

    B, Cin, H, W = 2, 4, 16, 16
    Cmid = 8

    x = jax.random.normal(k_x, (B, Cin, H, W), dtype=jnp.float32)      # NCHW

    w1 = jax.random.normal(k_w1, (Cmid, Cin, 3, 3), dtype=jnp.float32) * 0.1
    b1 = jax.random.normal(k_b1, (Cmid,), dtype=jnp.float32) * 0.1
    w2 = jax.random.normal(k_w2, (Cmid, Cmid, 3, 3), dtype=jnp.float32) * 0.1
    b2 = jax.random.normal(k_b2, (Cmid,), dtype=jnp.float32) * 0.1
    wf = jax.random.normal(k_wf, (10, Cmid * H * W), dtype=jnp.float32) * 0.01

    params = dict(w1=w1, b1=b1, w2=w2, b2=b2, wf=wf)
    extractor = FeatureExtractor(params, ["conv1", "relu1", "conv2", "fc"],
                                 H=H, W=W)
    outputs = extractor.forward(x)
    outputs = jax.tree_util.tree_map(jax.block_until_ready, outputs)

    # Reference check against XLA convolutions (pure JAX, no Pallas).
    def ref_conv(t, w, b):
        y = jax.lax.conv_general_dilated(
            t, w, window_strides=(1, 1), padding="SAME",
            dimension_numbers=("NCHW", "OIHW", "NCHW"))
        return y + b[None, :, None, None]

    r1 = ref_conv(x, w1, b1)
    r2 = jnp.maximum(r1, 0.0)
    r3 = ref_conv(r2, w2, b2)

    assert set(outputs.keys()) == {"conv1", "relu1", "conv2"}
    assert outputs["conv1"].shape == (B, Cmid, H, W)
    # Tolerance loosened vs. the all-f32 version: banded weights (and the MXU
    # LHS) are bf16, f32-accumulated.
    assert jnp.allclose(outputs["conv1"], r1, atol=5e-2)
    assert jnp.allclose(outputs["relu1"], r2, atol=5e-2)
    assert jnp.allclose(outputs["conv2"], r3, atol=5e-2)

    print("KERNEL_OK")
</pallas_src>

<mosaic_0001>
module attributes {stable_mosaic.version = 11 : i64} {
  func.func @_fused_cnn_kernel(%arg0: memref<32x128xf32, #tpu.memory_space<vmem>>, %arg1: memref<384x128xbf16, #tpu.memory_space<vmem>>, %arg2: memref<1x128xf32, #tpu.memory_space<vmem>>, %arg3: memref<384x128xbf16, #tpu.memory_space<vmem>>, %arg4: memref<1x128xf32, #tpu.memory_space<vmem>>, %arg5: memref<3x32x128xf32, #tpu.memory_space<vmem>>) attributes {dimension_semantics = [], scalar_prefetch = 0 : i64, scratch_operands = 0 : i64, tpu.core_type = #tpu.core_type<tc>} {
    %0 = tpu.iota {dimensions = array<i32: 1>} : vector<2x16x1xi32>
    %1 = vector.shape_cast %0 : vector<2x16x1xi32> to vector<32x1xi32>
    %c0_i32 = arith.constant 0 : i32
    %2 = vector.broadcast %c0_i32 : i32 to vector<32x1xi32>
    %3 = arith.cmpi ne, %1, %2 : vector<32x1xi32>
    %4 = arith.extui %3 : vector<32x1xi1> to vector<32x1xi32>
    %5 = arith.sitofp %4 : vector<32x1xi32> to vector<32x1xf32>
    %c15_i32 = arith.constant 15 : i32
    %6 = vector.broadcast %c15_i32 : i32 to vector<32x1xi32>
    %7 = arith.cmpi ne, %1, %6 : vector<32x1xi32>
    %8 = arith.extui %7 : vector<32x1xi1> to vector<32x1xi32>
    %9 = arith.sitofp %8 : vector<32x1xi32> to vector<32x1xf32>
    %c0 = arith.constant 0 : index
    %c0_0 = arith.constant 0 : index
    %10 = vector.load %arg0[%c0, %c0_0] : memref<32x128xf32, #tpu.memory_space<vmem>>, vector<32x128xf32>
    %c1_i32 = arith.constant 1 : i32
    %11 = tpu.dynamic_rotate %10 by %c1_i32 dim 0 : vector<32x128xf32>, i32 -> vector<32x128xf32>
    %12 = vector.broadcast %5 : vector<32x1xf32> to vector<32x128xf32>
    %13 = arith.mulf %11, %12 : vector<32x128xf32>
    %c31_i32 = arith.constant 31 : i32
    %14 = tpu.dynamic_rotate %10 by %c31_i32 dim 0 : vector<32x128xf32>, i32 -> vector<32x128xf32>
    %15 = vector.broadcast %9 : vector<32x1xf32> to vector<32x128xf32>
    %16 = arith.mulf %14, %15 : vector<32x128xf32>
    %17 = tpu.concatenate %13, %10, %16 in 1 : vector<32x128xf32>, vector<32x128xf32>, vector<32x128xf32> -> vector<32x384xf32>
    %18 = arith.truncf %17 : vector<32x384xf32> to vector<32x384xbf16>
    %c0_1 = arith.constant 0 : index
    %c0_2 = arith.constant 0 : index
    %19 = vector.load %arg1[%c0_1, %c0_2] : memref<384x128xbf16, #tpu.memory_space<vmem>>, vector<384x128xbf16>
    %cst = arith.constant dense<0.000000e+00> : vector<32x128xf32>
    %20 = tpu.matmul %18, %19, %cst {dimension_numbers = #tpu.dot_dimension_numbers<[1], [0], [0], [1], [0, 0, 1, 1], [], []>} : vector<32x384xbf16>, vector<384x128xbf16>, vector<32x128xf32> -> vector<32x128xf32>
    %c0_3 = arith.constant 0 : index
    %c0_4 = arith.constant 0 : index
    %21 = vector.load %arg2[%c0_3, %c0_4] : memref<1x128xf32, #tpu.memory_space<vmem>>, vector<1x128xf32>
    %22 = vector.broadcast %21 : vector<1x128xf32> to vector<32x128xf32>
    %23 = arith.addf %20, %22 : vector<32x128xf32>
    %c0_5 = arith.constant 0 : index
    %c0_6 = arith.constant 0 : index
    %c0_7 = arith.constant 0 : index
    %24 = vector.load %arg5[%c0_5, %c0_6, %c0_7] : memref<3x32x128xf32, #tpu.memory_space<vmem>>, vector<1x32x128xf32>
    %25 = vector.shape_cast %24 : vector<1x32x128xf32> to vector<32x128xf32>
    %26 = vector.shape_cast %23 : vector<32x128xf32> to vector<1x32x128xf32>
    tpu.vector_store %arg5[%c0_5, %c0_6, %c0_7], %26 {strides = array<i32>} : memref<3x32x128xf32, #tpu.memory_space<vmem>>, vector<1x32x128xf32>,
    %cst_8 = arith.constant 0.000000e+00 : f32
    %27 = vector.broadcast %cst_8 : f32 to vector<32x128xf32>
    %28 = arith.maximumf %23, %27 : vector<32x128xf32>
    %c1 = arith.constant 1 : index
    %c0_9 = arith.constant 0 : index
    %c0_10 = arith.constant 0 : index
    %29 = vector.load %arg5[%c1, %c0_9, %c0_10] : memref<3x32x128xf32, #tpu.memory_space<vmem>>, vector<1x32x128xf32>
    %30 = vector.shape_cast %29 : vector<1x32x128xf32> to vector<32x128xf32>
    %31 = vector.shape_cast %28 : vector<32x128xf32> to vector<1x32x128xf32>
    tpu.vector_store %arg5[%c1, %c0_9, %c0_10], %31 {strides = array<i32>} : memref<3x32x128xf32, #tpu.memory_space<vmem>>, vector<1x32x128xf32>,
    %c1_i32_11 = arith.constant 1 : i32
    %32 = tpu.dynamic_rotate %28 by %c1_i32_11 dim 0 : vector<32x128xf32>, i32 -> vector<32x128xf32>
    %33 = vector.broadcast %5 : vector<32x1xf32> to vector<32x128xf32>
    %34 = arith.mulf %32, %33 : vector<32x128xf32>
    %c31_i32_12 = arith.constant 31 : i32
    %35 = tpu.dynamic_rotate %28 by %c31_i32_12 dim 0 : vector<32x128xf32>, i32 -> vector<32x128xf32>
    %36 = vector.broadcast %9 : vector<32x1xf32> to vector<32x128xf32>
    %37 = arith.mulf %35, %36 : vector<32x128xf32>
    %38 = tpu.concatenate %34, %28, %37 in 1 : vector<32x128xf32>, vector<32x128xf32>, vector<32x128xf32> -> vector<32x384xf32>
    %39 = arith.truncf %38 : vector<32x384xf32> to vector<32x384xbf16>
    %c0_13 = arith.constant 0 : index
    %c0_14 = arith.constant 0 : index
    %40 = vector.load %arg3[%c0_13, %c0_14] : memref<384x128xbf16, #tpu.memory_space<vmem>>, vector<384x128xbf16>
    %cst_15 = arith.constant dense<0.000000e+00> : vector<32x128xf32>
    %41 = tpu.matmul %39, %40, %cst_15 {dimension_numbers = #tpu.dot_dimension_numbers<[1], [0], [0], [1], [0, 0, 1, 1], [], []>} : vector<32x384xbf16>, vector<384x128xbf16>, vector<32x128xf32> -> vector<32x128xf32>
    %c0_16 = arith.constant 0 : index
    %c0_17 = arith.constant 0 : index
    %42 = vector.load %arg4[%c0_16, %c0_17] : memref<1x128xf32, #tpu.memory_space<vmem>>, vector<1x128xf32>
    %43 = vector.broadcast %42 : vector<1x128xf32> to vector<32x128xf32>
    %44 = arith.addf %41, %43 : vector<32x128xf32>
    %c2 = arith.constant 2 : index
    %c0_18 = arith.constant 0 : index
    %c0_19 = arith.constant 0 : index
    %45 = vector.load %arg5[%c2, %c0_18, %c0_19] : memref<3x32x128xf32, #tpu.memory_space<vmem>>, vector<1x32x128xf32>
    %46 = vector.shape_cast %45 : vector<1x32x128xf32> to vector<32x128xf32>
    %47 = vector.shape_cast %44 : vector<32x128xf32> to vector<1x32x128xf32>
    tpu.vector_store %arg5[%c2, %c0_18, %c0_19], %47 {strides = array<i32>} : memref<3x32x128xf32, #tpu.memory_space<vmem>>, vector<1x32x128xf32>,
    return
  }
}

</mosaic_0001>

<bundles_post_ra>
// kernel: _fused_forward.1
= control target key start
LH: loop header
LB: loop body
LE: loop exit
PB: predicated region body
PF: predicated region fallthrough
CT: control target
= control target key end

     0   :  { %v21_v11 = vlaneseq  ;;  %v943_v28 = vmov 0.0   ;;  %s1223_s1 = inlined_call_operand.vmem [shape: bf16[384,128], index: 1, kind: input, shape index: {}]   ;;  %s1224_s0 = inlined_call_operand.vmem [shape: f32[32,128], index: 0, kind: input, shape index: {}]   ;;  %s1225_s3 = inlined_call_operand.vmem [shape: bf16[384,128], index: 3, kind: input, shape index: {}]   ;;  %s1226_s2 = inlined_call_operand.vmem [shape: f32[1,128], index: 2, kind: input, shape index: {}]   ;;  %s1227_s5 = inlined_call_operand.vmem [shape: f32[3,32,128], index: 5, kind: output, shape index: {}]   ;;  %s1228_s4 = inlined_call_operand.vmem [shape: f32[1,128], index: 4, kind: input, shape index: {}]  }
   0x1   :  { %v895_v0 = vld [vmem:[%s1223_s1 + $0x40] sm:$0xff]   ;;  %v897_v2 = vld [vmem:[%s1223_s1 + $0x48] sm:$0xff]   ;;  %v900_v5 = vld [vmem:[%s1223_s1 + $0x50] sm:$0xff]  }
   0x2   :  { %v896_v1 = vld [vmem:[%s1223_s1] sm:$0xff]   ;;  %778 = vmatprep.subr.bf16.mxu0 %v895_v0  ;;  %v899_v4 = vld [vmem:[%s1223_s1 + $0x8] sm:$0xff]   ;;  %v902_v7 = vld [vmem:[%s1223_s1 + $0x10] sm:$0xff]   ;;  %v1016_v15 = vshrl.u32 %v21_v11, 7 }
   0x3   :  { %779 = vmatpush3.bf16.msra.mxu0 %v896_v1  ;;  %v898_v3 = vld [vmem:[%s1223_s1 + $0x80] sm:$0xff]   ;;  %v901_v6 = vld [vmem:[%s1223_s1 + $0x88] sm:$0xff]   ;;  %v903_v8 = vld [vmem:[%s1223_s1 + $0x58] sm:$0xff]  }
   0x4   :  { %780 = vmatprep.subr.bf16.mxu0 %v897_v2  ;;  %854 = vmatprep.subr.bf16.mxu1 %v898_v3  ;;  %v904_v9 = vld [vmem:[%s1223_s1 + $0x90] sm:$0xff]   ;;  %v905_v10 = vld [vmem:[%s1223_s1 + $0x18] sm:$0xff]   ;;  %v906_v12 = vld [vmem:[%s1223_s1 + $0x60] sm:$0xff]   ;;  %v23_v19 = vadd.s32 8, %v1016_v15  ;;  %vm24_vm0 = vcmp.ne.s32.totalorder %v1016_v15, 0  ;;  %vm44_vm2 = vcmp.lt.s32.totalorder %v1016_v15, 1 }
   0x5   :  { %855 = vmatpush3.bf16.msra.mxu1 %v898_v3  ;;  %v907_v13 = vld [vmem:[%s1223_s1 + $0x98] sm:$0xff]   ;;  %v908_v14 = vld [vmem:[%s1223_s1 + $0x20] sm:$0xff]   ;;  %v909_v17 = vld [vmem:[%s1223_s1 + $0x68] sm:$0xff]   ;;  %v1053_v29 = vsel %vm24_vm0, 1.0, %v943_v28  ;;  %vm57_vm3 = vcmp.lt.s32.totalorder %v1016_v15, 7 }
   0x6   :  { %856 = vmatprep.subr.bf16.mxu1 %v901_v6  ;;  %v910_v16 = vld [vmem:[%s1223_s1 + $0xa0] sm:$0xff]   ;;  %v911_v18 = vld [vmem:[%s1223_s1 + $0x28] sm:$0xff]   ;;  %v912_v21 = vld [vmem:[%s1223_s1 + $0x70] sm:$0xff]   ;;  %vm31_vm1 = vcmp.ne.s32.totalorder %v23_v19, 15 }
   0x7   :  { %781 = vmatpush3.bf16.msra.mxu0 %v899_v4  ;;  %v913_v20 = vld [vmem:[%s1223_s1 + $0xa8] sm:$0xff]   ;;  %v914_v22 = vld [vmem:[%s1223_s1 + $0x30] sm:$0xff]   ;;  %v915_v23 = vld [vmem:[%s1223_s1 + $0x78] sm:$0xff]   ;;  %v1058_v36 = vsel %vm31_vm1, 1.0, %v943_v28 }
   0x8   :  { %782 = vmatprep.subr.bf16.mxu0 %v900_v5  ;;  %v916_v24 = vld [vmem:[%s1223_s1 + $0xb0] sm:$0xff]   ;;  %v36_v25 = vld [vmem:[%s1224_s0] sm:$0xff]  ;;  %v37_v26 = vld [vmem:[%s1224_s0 + $0x8] sm:$0xff] }
   0x9   :  { %857 = vmatpush3.bf16.msra.mxu1 %v901_v6  ;;  %v39_v27 = vld [vmem:[%s1224_s0 + $0x18] sm:$0xff]  ;;  %v40_v30 = vrot.slane %v36_v25, 7  ;;  %v41_v31 = vrot.slane %v37_v26, 7  ;;  %v53_v32 = vrot.slane %v36_v25, 1  ;;  %v54_v33 = vrot.slane %v37_v26, 1  ;;  %v38_v37 = vld [vmem:[%s1224_s0 + $0x10] sm:$0xff] }
   0xa   :  { %858 = vmatprep.subr.bf16.mxu1 %v904_v9  ;;  %v67_v34 = vpack.c.bf16 %v37_v26, %v36_v25  ;;  %v43_v35 = vrot.slane %v39_v27, 7  ;;  %v56_v38 = vrot.slane %v39_v27, 1  ;;  %v917_v39 = vld [vmem:[%s1223_s1 + $0x38] sm:$0xff]   ;;  %v55_v40 = vrot.slane %v38_v37, 1  ;;  %v919_v49 = vld [vmem:[%s1225_s3 + $0x40] sm:$0xff]   ;;  %v922_v59 = vld [vmem:[%s1225_s3 + $0x48] sm:$0xff]  }
   0xb   :  { %783 = vmatpush3.bf16.msra.mxu0 %v902_v7  ;;  %v47_v41 = vsel %vm44_vm2, %v40_v30, %v41_v31  ;;  %v918_v43 = vld [vmem:[%s1223_s1 + $0xb8] sm:$0xff]   ;;  %v42_v45 = vrot.slane %v38_v37, 7  ;;  %v60_v48 = vsel %vm57_vm3, %v53_v32, %v54_v33  ;;  %v920_v52 = vld [vmem:[%s1225_s3 + $0x80] sm:$0xff]   ;;  %v70_v57 = vpack.c.bf16 %v39_v27, %v38_v37  ;;  %v923_v61 = vld [vmem:[%s1225_s3 + $0x88] sm:$0xff]  }
   0xc   :  { %784 = vmatprep.subr.bf16.mxu0 %v903_v8  ;;  %v48_v42 = vsel %vm44_vm2, %v43_v35, %v40_v30  ;;  %v61_v44 = vsel %vm57_vm3, %v56_v38, %v53_v32  ;;  %303 = vmatprep.mubr.bf16.mxu0 %v67_v34  ;;  %v59_v47 = vsel %vm57_vm3, %v54_v33, %v55_v40  ;;  %v921_v55 = vld [vmem:[%s1225_s3] sm:$0xff]   ;;  %v924_v1 = vld [vmem:[%s1225_s3 + $0x8] sm:$0xff]   ;;  %v925_v2 = vld [vmem:[%s1225_s3 + $0x50] sm:$0xff]  }
   0xd   :  { %859 = vmatpush3.bf16.msra.mxu1 %v904_v9  ;;  %v49_v46 = vmul.f32 %v1053_v29, %v48_v42  ;;  %v63_v50 = vmul.f32 %v1058_v36, %v59_v47  ;;  %v65_v51 = vmul.f32 %v1058_v36, %v61_v44  ;;  %v58_v54 = vsel %vm57_vm3, %v55_v40, %v56_v38  ;;  %v926_v3 = vld [vmem:[%s1225_s3 + $0x90] sm:$0xff]   ;;  %v928_v5 = vld [vmem:[%s1225_s3 + $0x58] sm:$0xff]   ;;  %v931_v8 = vld [vmem:[%s1225_s3 + $0x60] sm:$0xff]  }
   0xe   :  { %860 = vmatprep.subr.bf16.mxu1 %v907_v13  ;;  %v46_v58 = vsel %vm44_vm2, %v41_v31, %v42_v45  ;;  %v45_v63 = vsel %vm44_vm2, %v42_v45, %v43_v35  ;;  %v927_v4 = vld [vmem:[%s1225_s3 + $0x10] sm:$0xff]   ;;  %v929_v6 = vld [vmem:[%s1225_s3 + $0x98] sm:$0xff]   ;;  %v932_v9 = vld [vmem:[%s1225_s3 + $0xa0] sm:$0xff]  }
   0xf   :  { %785 = vmatpush3.bf16.msra.mxu0 %v905_v10  ;;  %v66_v53 = vpack.c.bf16 %v47_v41, %v49_v46  ;;  %v68_v56 = vpack.c.bf16 %v63_v50, %v60_v48  ;;  %v71_v60 = vpack.c.bf16 %v65_v51, %v58_v54  ;;  %v51_v62 = vmul.f32 %v1053_v29, %v46_v58  ;;  %v930_v7 = vld [vmem:[%s1225_s3 + $0x18] sm:$0xff]   ;;  %v933_v10 = vld [vmem:[%s1225_s3 + $0x20] sm:$0xff]   ;;  %v934_v11 = vld [vmem:[%s1225_s3 + $0x68] sm:$0xff]  }
  0x10   :  { %786 = vmatprep.subr.bf16.mxu0 %v906_v12  ;;  %v935_v12 = vld [vmem:[%s1225_s3 + $0xa8] sm:$0xff]   ;;  %v941_v19 = vld [vmem:[%s1225_s3 + $0xb8] sm:$0xff]   ;;  %v749_v15 = vld [vmem:[%s1228_s4] ss:$0 sm:$0xff] }
  0x11   :  { %861 = vmatpush3.bf16.msra.mxu1 %v907_v13  ;;  %870 = vmatprep.mubr.bf16.mxu1 %v68_v56  ;;  %v69_v0 = vpack.c.bf16 %v45_v63, %v51_v62  ;;  %v936_v13 = vld [vmem:[%s1225_s3 + $0x28] sm:$0xff]  }
  0x12   :  { %862 = vmatprep.subr.bf16.mxu1 %v910_v16 }
  0x13   :  { %787 = vmatpush3.bf16.msra.mxu0 %v908_v14  ;;  %v937_v14 = vld [vmem:[%s1225_s3 + $0x70] sm:$0xff]  }
  0x14   :  { %788 = vmatprep.subr.bf16.mxu0 %v909_v17  ;;  %v939_v17 = vld [vmem:[%s1225_s3 + $0x30] sm:$0xff]  }
  0x15   :  { %863 = vmatpush3.bf16.msra.mxu1 %v910_v16  ;;  %v938_v16 = vld [vmem:[%s1225_s3 + $0xb0] sm:$0xff]  }
  0x16   :  { %864 = vmatprep.subr.bf16.mxu1 %v913_v20 }
  0x17   :  { %789 = vmatpush3.bf16.msra.mxu0 %v911_v18  ;;  %v940_v18 = vld [vmem:[%s1225_s3 + $0x78] sm:$0xff]  }
  0x18   :  { %790 = vmatprep.subr.bf16.mxu0 %v912_v21 }
  0x19   :  { %865 = vmatpush3.bf16.msra.mxu1 %v913_v20  ;;  %v942_v20 = vld [vmem:[%s1225_s3 + $0x38] sm:$0xff]  }
  0x1a   :  { %866 = vmatprep.subr.bf16.mxu1 %v916_v24 }
  0x1b   :  { %791 = vmatpush3.bf16.msra.mxu0 %v914_v22 }
  0x1c   :  { %792 = vmatprep.subr.bf16.mxu0 %v915_v23  ;;  %v720_v23 = vld [vmem:[%s1226_s2] ss:$0 sm:$0xff] }
  0x1d   :  { %867 = vmatpush3.bf16.msra.mxu1 %v916_v24 }
  0x1e   :  { %868 = vmatprep.subr.bf16.mxu1 %v918_v43 }
  0x1f   :  { %793 = vmatpush3.bf16.msra.mxu0 %v917_v39 }
  0x20   :  { %816 = vmatprep.subr.bf16.mxu0 %v919_v49 }
  0x21   :  { %869 = vmatpush3.bf16.msra.mxu1 %v918_v43 }
  0x22   :  { %304 = vmatmul.mubr.bf16.vlgmr.msra.gmra.mrb[0].mxu0 %v66_v53  ;;  %874 = vmatprep.subr.bf16.mxu1 %v920_v52 }
  0x23   :  { %311 = vmatprep.mubr.bf16.mxu0 %v70_v57  ;;  %817 = vmatpush3.bf16.msra.mxu0 %v921_v55 }
  0x24   :  { %871 = vmatmul.mubr.bf16.vlgmr.msra.gmra.mrb[0].mxu1 %v71_v60  ;;  %818 = vmatprep.subr.bf16.mxu0 %v922_v59 }
  0x25   :  { %875 = vmatpush3.bf16.msra.mxu1 %v920_v52 }
  0x26   :  { %876 = vmatprep.subr.bf16.mxu1 %v923_v61 }
  0x27   :  { %819 = vmatpush3.bf16.msra.mxu0 %v924_v1 }
  0x28   :  { %820 = vmatprep.subr.bf16.mxu0 %v925_v2 }
  0x29   :  { %877 = vmatpush3.bf16.msra.mxu1 %v923_v61 }
  0x2a   :  { %312 = vmatmul.mubr.bf16.gmra.mrb[4].mxu0 %v69_v0  ;;  %878 = vmatprep.subr.bf16.mxu1 %v926_v3 }
  0x2b   :  { %821 = vmatpush3.bf16.msra.mxu0 %v927_v4 }
  0x2c   :  { %822 = vmatprep.subr.bf16.mxu0 %v928_v5 }
  0x2d   :  { %879 = vmatpush3.bf16.msra.mxu1 %v926_v3 }
  0x2e   :  { %880 = vmatprep.subr.bf16.mxu1 %v929_v6 }
  0x2f   :  { %823 = vmatpush3.bf16.msra.mxu0 %v930_v7 }
  0x30   :  { %824 = vmatprep.subr.bf16.mxu0 %v931_v8 }
  0x31   :  { %881 = vmatpush3.bf16.msra.mxu1 %v929_v6 }
  0x32   :  { %882 = vmatprep.subr.bf16.mxu1 %v932_v9 }
  0x33   :  { %825 = vmatpush3.bf16.msra.mxu0 %v933_v10 }
  0x34   :  { %826 = vmatprep.subr.bf16.mxu0 %v934_v11 }
  0x35   :  { %883 = vmatpush3.bf16.msra.mxu1 %v932_v9 }
  0x36   :  { %884 = vmatprep.subr.bf16.mxu1 %v935_v12 }
  0x37   :  { %827 = vmatpush3.bf16.msra.mxu0 %v936_v13 }
  0x38   :  { %828 = vmatprep.subr.bf16.mxu0 %v937_v14 }
  0x39   :  { %885 = vmatpush3.bf16.msra.mxu1 %v935_v12 }
  0x3a   :  { %886 = vmatprep.subr.bf16.mxu1 %v938_v16 }
  0x3b   :  { %829 = vmatpush3.bf16.msra.mxu0 %v939_v17 }
  0x3c   :  { %830 = vmatprep.subr.bf16.mxu0 %v940_v18 }
  0x3d   :  { %887 = vmatpush3.bf16.msra.mxu1 %v938_v16 }
  0x3e   :  { %888 = vmatprep.subr.bf16.mxu1 %v941_v19 }
  0x3f   :  { %831 = vmatpush3.bf16.msra.mxu0 %v942_v20 }
  0x41   :  { %889 = vmatpush3.bf16.msra.mxu1 %v941_v19 }
  0xf5   :  { %v794_v21 = vpop.f32.mrb[0].mxu0 }
  0xf6   :  { %v795_v22 = vpop.f32.mrb[1].mxu0 }
  0xf7   :  { %v796_v24 = vadd.f32 %v795_v22, %v794_v21  ;;  %v797_v25 = vpop.f32.mrb[2].mxu0  ;;  %v872_v27 = vpop.f32.mrb[0].mxu1 }
  0xf8   :  { %v798_v26 = vpop.f32.mrb[3].mxu0  ;;  %v354_v31 = vpop.f32.mrb[1].mxu1 }
  0xf9   :  { %v799_v28 = vadd.f32 %v798_v26, %v797_v25  ;;  %v306_v30 = vadd.f32 %v796_v24, %v720_v23  ;;  %v873_v32 = vpop.f32.mrb[2].mxu1 }
  0xfa   :  { %v357_v35 = vpop.f32.mrb[3].mxu1 }
  0xfb   :  { %v355_v33 = vadd.f32 %v354_v31, %v306_v30  ;;  %v309_v34 = vadd.f32 %v799_v28, %v720_v23 }
  0xfd   :  { %369 = vst [vmem:[%s1227_s5] sm:$0xff] %v355_v33  ;;  %v373_v37 = vmax.f32 %v355_v33, 0.0  ;;  %v358_v38 = vadd.f32 %v357_v35, %v309_v34  ;;  %v800_v39 = vpop.f32.mrb[4].mxu0 }
  0xfe   :  { %v801_v40 = vpop.f32.mrb[5].mxu0 }
  0xff   :  { %745 = vst [vmem:[%s1227_s5 + $0x20] sm:$0xff] %v373_v37  ;;  %370 = vst [vmem:[%s1227_s5 + $0x8] sm:$0xff] %v358_v38  ;;  %v374_v41 = vmax.f32 %v358_v38, 0.0  ;;  %v802_v42 = vadd.f32 %v801_v40, %v800_v39  ;;  %v803_v43 = vpop.f32.mrb[6].mxu0  ;;  %v382_v44 = vrot.slane %v373_v37, 7  ;;  %v394_v50 = vrot.slane %v373_v37, 1 }
 0x100   :  { %v804_v45 = vpop.f32.mrb[7].mxu0 }
 0x101   :  { %746 = vst [vmem:[%s1227_s5 + $0x28] sm:$0xff] %v374_v41  ;;  %v383_v46 = vrot.slane %v374_v41, 7  ;;  %v314_v47 = vadd.f32 %v802_v42, %v720_v23  ;;  %v805_v48 = vadd.f32 %v804_v45, %v803_v43  ;;  %v407_v49 = vpack.c.bf16 %v374_v41, %v373_v37 }
 0x102   :  { %v395_v51 = vrot.slane %v374_v41, 1 }
 0x103   :  { %v363_v52 = vadd.f32 %v872_v27, %v314_v47  ;;  %v317_v53 = vadd.f32 %v805_v48, %v720_v23  ;;  %643 = vmatprep.mubr.bf16.mxu0 %v407_v49  ;;  %v388_v54 = vsel %vm44_vm2, %v382_v44, %v383_v46 }
 0x104   :  { %v400_v55 = vsel %vm57_vm3, %v394_v50, %v395_v51 }
 0x105   :  { %371 = vst [vmem:[%s1227_s5 + $0x10] sm:$0xff] %v363_v52  ;;  %v375_v56 = vmax.f32 %v363_v52, 0.0  ;;  %v366_v57 = vadd.f32 %v873_v32, %v317_v53 }
 0x107   :  { %747 = vst [vmem:[%s1227_s5 + $0x30] sm:$0xff] %v375_v56  ;;  %372 = vst [vmem:[%s1227_s5 + $0x18] sm:$0xff] %v366_v57  ;;  %v376_v58 = vmax.f32 %v366_v57, 0.0  ;;  %v396_v59 = vrot.slane %v375_v56, 1  ;;  %v384_v60 = vrot.slane %v375_v56, 7 }
 0x109   :  { %748 = vst [vmem:[%s1227_s5 + $0x38] sm:$0xff] %v376_v58  ;;  %v385_v61 = vrot.slane %v376_v58, 7  ;;  %v399_v62 = vsel %vm57_vm3, %v395_v51, %v396_v59  ;;  %v397_v63 = vrot.slane %v376_v58, 1  ;;  %v410_v0 = vpack.c.bf16 %v376_v58, %v375_v56 }
 0x10a   :  { %v403_v1 = vmul.f32 %v1058_v36, %v399_v62  ;;  %v387_v2 = vsel %vm44_vm2, %v383_v46, %v384_v60 }
 0x10b   :  { %v389_v3 = vsel %vm44_vm2, %v385_v61, %v382_v44  ;;  %v398_v4 = vsel %vm57_vm3, %v396_v59, %v397_v63  ;;  %v401_v5 = vsel %vm57_vm3, %v397_v63, %v394_v50  ;;  %v386_v6 = vsel %vm44_vm2, %v384_v60, %v385_v61 }
 0x10c   :  { %v408_v7 = vpack.c.bf16 %v403_v1, %v400_v55  ;;  %v390_v8 = vmul.f32 %v1053_v29, %v389_v3  ;;  %v405_v9 = vmul.f32 %v1058_v36, %v401_v5  ;;  %v392_v10 = vmul.f32 %v1053_v29, %v387_v2 }
 0x10e   :  { %890 = vmatprep.mubr.bf16.mxu1 %v408_v7  ;;  %v406_v11 = vpack.c.bf16 %v388_v54, %v390_v8  ;;  %v411_v12 = vpack.c.bf16 %v405_v9, %v398_v4  ;;  %v409_v13 = vpack.c.bf16 %v386_v6, %v392_v10 }
 0x110   :  { %644 = vmatmul.mubr.bf16.vlgmr.msra.gmra.mrb[8].mxu0 %v406_v11  ;;  %891 = vmatmul.mubr.bf16.vlgmr.msra.gmra.mrb[4].mxu1 %v411_v12 }
 0x111   :  { %651 = vmatprep.mubr.bf16.mxu0 %v410_v0 }
 0x118   :  { %652 = vmatmul.mubr.bf16.gmra.mrb[12].mxu0 %v409_v13 }
 0x1e3   :  { %v832_v14 = vpop.f32.mrb[8].mxu0  ;;  %v892_v16 = vpop.f32.mrb[4].mxu1 }
 0x1e4   :  { %v833_v17 = vpop.f32.mrb[9].mxu0  ;;  %v694_v18 = vpop.f32.mrb[5].mxu1 }
 0x1e5   :  { %v834_v19 = vadd.f32 %v833_v17, %v832_v14  ;;  %v835_v36 = vpop.f32.mrb[10].mxu0  ;;  %v893_v20 = vpop.f32.mrb[6].mxu1 }
 0x1e6   :  { %v836_v29 = vpop.f32.mrb[11].mxu0  ;;  %v697_v21 = vpop.f32.mrb[7].mxu1 }
 0x1e7   :  { %v646_v22 = vadd.f32 %v834_v19, %v749_v15  ;;  %v837_v23 = vadd.f32 %v836_v29, %v835_v36 }
 0x1e9   :  { %v695_v24 = vadd.f32 %v694_v18, %v646_v22  ;;  %v649_v25 = vadd.f32 %v837_v23, %v749_v15 }
 0x1eb   :  { %774 = vst [vmem:[%s1227_s5 + $0x40] sm:$0xff] %v695_v24  ;;  %v698_v26 = vadd.f32 %v697_v21, %v649_v25  ;;  %v838_v27 = vpop.f32.mrb[12].mxu0 }
 0x1ec   :  { %v839_v28 = vpop.f32.mrb[13].mxu0 }
 0x1ed   :  { %775 = vst [vmem:[%s1227_s5 + $0x48] sm:$0xff] %v698_v26  ;;  %v840_v30 = vadd.f32 %v839_v28, %v838_v27  ;;  %v841_v31 = vpop.f32.mrb[14].mxu0 }
 0x1ee   :  { %v842_v32 = vpop.f32.mrb[15].mxu0 }
 0x1ef   :  { %v654_v33 = vadd.f32 %v840_v30, %v749_v15  ;;  %v843_v34 = vadd.f32 %v842_v32, %v841_v31 }
 0x1f1   :  { %v703_v35 = vadd.f32 %v892_v16, %v654_v33  ;;  %v657_v37 = vadd.f32 %v843_v34, %v749_v15 }
 0x1f3   :  { %776 = vst [vmem:[%s1227_s5 + $0x50] sm:$0xff] %v703_v35  ;;  %v706_v38 = vadd.f32 %v893_v20, %v657_v37 }
 0x1f5   :  { %777 = vst [vmem:[%s1227_s5 + $0x58] sm:$0xff] %v706_v38 }

</bundles_post_ra>
